<compile_context>
chip_gen: v6e
topology: v6e:2x2x1
jax: 0.10.0
libtpu: 0.0.40
codegen_flags: <defaults>
</compile_context>

<pallas_src>
import jax
import jax.numpy as jnp
from jax.experimental import pallas as pl
from jax.experimental.pallas import tpu as pltpu


def _round_up(v, m):
    return -(-v // m) * m


def linear_kernel(x_ref, w_ref, b_ref, o_ref):
    # x_ref: (TM, K) f32   w_ref: (K, N) bf16   b_ref: (1, N) f32
    # o_ref: (TM, N) out_dtype
    x = x_ref[...].astype(w_ref.dtype)  # VPU cast; free in an HBM-bound kernel
    acc = jnp.dot(x, w_ref[...], preferred_element_type=jnp.float32)
    o_ref[...] = (acc + b_ref[...]).astype(o_ref.dtype)


def prepare_aggregator_params(weight, bias, *, compute_dtype=jnp.bfloat16):
    """One-time prep: transpose + cast the Linear parameters (no padding).

    weight: [out_dim, combined_n], bias: [out_dim]
    Returns (w_t [K, N] compute_dtype, bias2d [1, N] f32).
    """
    w_t = weight.T.astype(compute_dtype)            # (K, N)
    b2d = bias.astype(jnp.float32).reshape(1, -1)   # (1, N)
    return w_t, b2d


def _vmem_capacity_bytes():
    try:
        return int(pltpu.get_tpu_info().vmem_capacity_bytes)
    except Exception:
        return 64 << 20  # conservative default (v7x per-TC capacity)


def aggregator_forward(x, w_t, bias2d, *, tm_max=512, out_dtype=None):
    """x: [..., combined_n] -> [..., out_dim]."""
    K, N = w_t.shape
    lead_shape = x.shape[:-1]
    out_dtype = x.dtype if out_dtype is None else out_dtype

    x2d = x.reshape(-1, K)  # stays f32 in HBM; cast happens inside the kernel
    M = x2d.shape[0]

    x_bytes = x2d.dtype.itemsize
    w_bytes = w_t.dtype.itemsize
    o_bytes = jnp.dtype(out_dtype).itemsize

    # ---- VMEM budget -> row tile (per-generation via get_tpu_info) --------
    vmem_cap = _vmem_capacity_bytes()
    budget = max(vmem_cap // 2, 8 << 20)            # use at most half of VMEM
    resident = K * N * w_bytes + N * 4              # single-buffered W^T + bias
    per_row = 2 * K * x_bytes + 2 * N * o_bytes     # double-buffered x/out tiles
    tm_fit = max((budget - resident) // max(per_row, 1), 16)
    # Note: if a huge out_dim made `resident` alone blow the budget (v7x),
    # the right fix is an outer N grid axis (W tile (K, tn)), not a tiny tm.
    tm_cap = max((int(min(tm_max, tm_fit)) // 16) * 16, 16)

    # Ensure >= 2 grid steps along the parallel M axis whenever M > 16 so both
    # v7x TensorCores are used; costs ~nothing on single-TC v5e/v6e.
    tm_eff = max(16, min(tm_cap, _round_up(pl.cdiv(M, 2), 16)))
    grid = (pl.cdiv(M, tm_eff),)

    needed = resident + tm_eff * per_row
    vmem_limit = int(min(max(needed + (4 << 20), 32 << 20), vmem_cap))

    cost = pl.CostEstimate(
        flops=2 * M * K * N,
        transcendentals=0,
        bytes_accessed=M * K * x_bytes + K * N * w_bytes + N * 4 + M * N * o_bytes,
    )

    def _call(single_buffer_resident):
        if single_buffer_resident:
            w_spec = pl.BlockSpec((K, N), lambda i: (0, 0),
                                  pipeline_mode=pl.Buffered(1))
            b_spec = pl.BlockSpec((1, N), lambda i: (0, 0),
                                  pipeline_mode=pl.Buffered(1))
        else:
            w_spec = pl.BlockSpec((K, N), lambda i: (0, 0))
            b_spec = pl.BlockSpec((1, N), lambda i: (0, 0))
        return pl.pallas_call(
            linear_kernel,
            out_shape=jax.ShapeDtypeStruct((M, N), out_dtype),
            grid=grid,
            in_specs=[
                pl.BlockSpec((tm_eff, K), lambda i: (i, 0)),  # x row tile (f32)
                w_spec,                                        # resident W^T (bf16)
                b_spec,                                        # resident bias (f32)
            ],
            out_specs=pl.BlockSpec((tm_eff, N), lambda i: (i, 0)),
            compiler_params=pltpu.CompilerParams(
                dimension_semantics=("parallel",),
                vmem_limit_bytes=vmem_limit),
            cost_estimate=cost,
        )(x2d, w_t, bias2d)

    try:
        out = _call(True)    # single-buffer resident operands (VMEM saving)
    except Exception:
        out = _call(False)   # fallback if pipeline_mode is unsupported

    return out.reshape(*lead_shape, N)


if __name__ == "__main__":
    key = jax.random.PRNGKey(0)
    k_x, k_w = jax.random.split(key)

    batch, seq = 2, 8
    combined_n, out_dim = 64, 32

    # Deterministic "module init": weight ~ N(0, 0.03), bias = 0
    weight = 0.03 * jax.random.normal(k_w, (out_dim, combined_n), dtype=jnp.float32)
    bias = jnp.zeros((out_dim,), dtype=jnp.float32)

    x = jax.random.normal(k_x, (batch, seq, combined_n), dtype=jnp.float32)

    # Hoisted one-time parameter prep (transpose + bf16 cast).
    w_t, b2d = prepare_aggregator_params(weight, bias)

    y = aggregator_forward(x, w_t, b2d)
    jax.block_until_ready(y)

    # Sanity check against plain-JAX f32 reference (bf16 weights => loosen tol).
    y_ref = x @ weight.T + bias
    assert y.shape == (batch, seq, out_dim)
    assert jnp.allclose(y, y_ref, atol=2e-2, rtol=2e-2), "mismatch vs reference"

    print("KERNEL_OK")
</pallas_src>

<mosaic_0001>
module attributes {stable_mosaic.version = 11 : i64} {
  func.func @linear_kernel(%arg0: i32, %arg1: memref<16x64xf32, #tpu.memory_space<vmem>>, %arg2: memref<64x32xbf16, #tpu.memory_space<vmem>>, %arg3: memref<1x32xf32, #tpu.memory_space<vmem>>, %arg4: memref<16x32xf32, #tpu.memory_space<vmem>>) attributes {dimension_semantics = [#tpu.dimension_semantics<parallel>], iteration_bounds = array<i64: 1>, scalar_prefetch = 0 : i64, scratch_operands = 0 : i64, tpu.core_type = #tpu.core_type<tc>, window_params = [{transform_indices = @transform_0, window_bounds = array<i64: 16, 64>}, {pipeline_mode = #tpu.pipeline_mode<synchronous>, transform_indices = @transform_1, window_bounds = array<i64: 64, 32>}, {pipeline_mode = #tpu.pipeline_mode<synchronous>, transform_indices = @transform_2, window_bounds = array<i64: 1, 32>}, {transform_indices = @transform_3, window_bounds = array<i64: 16, 32>}]} {
    %c0 = arith.constant 0 : index
    %c0_0 = arith.constant 0 : index
    %0 = vector.load %arg1[%c0, %c0_0] : memref<16x64xf32, #tpu.memory_space<vmem>>, vector<16x64xf32>
    %1 = arith.truncf %0 : vector<16x64xf32> to vector<16x64xbf16>
    %c0_1 = arith.constant 0 : index
    %c0_2 = arith.constant 0 : index
    %2 = vector.load %arg2[%c0_1, %c0_2] : memref<64x32xbf16, #tpu.memory_space<vmem>>, vector<64x32xbf16>
    %cst = arith.constant dense<0.000000e+00> : vector<16x32xf32>
    %3 = tpu.matmul %1, %2, %cst {dimension_numbers = #tpu.dot_dimension_numbers<[1], [0], [0], [1], [0, 0, 1, 1], [], []>} : vector<16x64xbf16>, vector<64x32xbf16>, vector<16x32xf32> -> vector<16x32xf32>
    %c0_3 = arith.constant 0 : index
    %c0_4 = arith.constant 0 : index
    %4 = vector.load %arg3[%c0_3, %c0_4] : memref<1x32xf32, #tpu.memory_space<vmem>>, vector<1x32xf32>
    %5 = vector.broadcast %4 : vector<1x32xf32> to vector<16x32xf32>
    %6 = arith.addf %3, %5 : vector<16x32xf32>
    %c0_5 = arith.constant 0 : index
    %c0_6 = arith.constant 0 : index
    %7 = vector.load %arg4[%c0_5, %c0_6] : memref<16x32xf32, #tpu.memory_space<vmem>>, vector<16x32xf32>
    tpu.vector_store %arg4[%c0_5, %c0_6], %6 {strides = array<i32>} : memref<16x32xf32, #tpu.memory_space<vmem>>, vector<16x32xf32>,
    return
  }
  func.func @transform_0(%arg0: i32) -> (i32, i32) {
    %c0_i32 = arith.constant 0 : i32
    %c0_i32_0 = arith.constant 0 : i32
    return %arg0, %c0_i32 : i32, i32
  }
  func.func @transform_1(%arg0: i32) -> (i32, i32) {
    %c0_i32 = arith.constant 0 : i32
    %c0_i32_0 = arith.constant 0 : i32
    %c0_i32_1 = arith.constant 0 : i32
    return %c0_i32, %c0_i32_0 : i32, i32
  }
  func.func @transform_2(%arg0: i32) -> (i32, i32) {
    %c0_i32 = arith.constant 0 : i32
    %c0_i32_0 = arith.constant 0 : i32
    %c0_i32_1 = arith.constant 0 : i32
    return %c0_i32, %c0_i32_0 : i32, i32
  }
  func.func @transform_3(%arg0: i32) -> (i32, i32) {
    %c0_i32 = arith.constant 0 : i32
    %c0_i32_0 = arith.constant 0 : i32
    return %arg0, %c0_i32 : i32, i32
  }
}

module attributes {stable_mosaic.version = 11 : i64} {
  func.func @linear_kernel(%arg0: i32, %arg1: memref<16x64xf32, #tpu.memory_space<vmem>>, %arg2: memref<64x32xbf16, #tpu.memory_space<vmem>>, %arg3: memref<1x32xf32, #tpu.memory_space<vmem>>, %arg4: memref<16x32xf32, #tpu.memory_space<vmem>>) attributes {dimension_semantics = [#tpu.dimension_semantics<parallel>], iteration_bounds = array<i64: 1>, scalar_prefetch = 0 : i64, scratch_operands = 0 : i64, tpu.core_type = #tpu.core_type<tc>, window_params = [{transform_indices = @transform_0, window_bounds = array<i64: 16, 64>}, {pipeline_mode = #tpu.pipeline_mode<synchronous>, transform_indices = @transform_1, window_bounds = array<i64: 64, 32>}, {pipeline_mode = #tpu.pipeline_mode<synchronous>, transform_indices = @transform_2, window_bounds = array<i64: 1, 32>}, {transform_indices = @transform_3, window_bounds = array<i64: 16, 32>}]} {
    %c0 = arith.constant 0 : index
    %c0_0 = arith.constant 0 : index
    %0 = vector.load %arg1[%c0, %c0_0] : memref<16x64xf32, #tpu.memory_space<vmem>>, vector<16x64xf32>
    %1 = arith.truncf %0 : vector<16x64xf32> to vector<16x64xbf16>
    %c0_1 = arith.constant 0 : index
    %c0_2 = arith.constant 0 : index
    %2 = vector.load %arg2[%c0_1, %c0_2] : memref<64x32xbf16, #tpu.memory_space<vmem>>, vector<64x32xbf16>
    %cst = arith.constant dense<0.000000e+00> : vector<16x32xf32>
    %3 = tpu.matmul %1, %2, %cst {dimension_numbers = #tpu.dot_dimension_numbers<[1], [0], [0], [1], [0, 0, 1, 1], [], []>} : vector<16x64xbf16>, vector<64x32xbf16>, vector<16x32xf32> -> vector<16x32xf32>
    %c0_3 = arith.constant 0 : index
    %c0_4 = arith.constant 0 : index
    %4 = vector.load %arg3[%c0_3, %c0_4] : memref<1x32xf32, #tpu.memory_space<vmem>>, vector<1x32xf32>
    %5 = vector.broadcast %4 : vector<1x32xf32> to vector<16x32xf32>
    %6 = arith.addf %3, %5 : vector<16x32xf32>
    %c0_5 = arith.constant 0 : index
    %c0_6 = arith.constant 0 : index
    %7 = vector.load %arg4[%c0_5, %c0_6] : memref<16x32xf32, #tpu.memory_space<vmem>>, vector<16x32xf32>
    tpu.vector_store %arg4[%c0_5, %c0_6], %6 {strides = array<i32>} : memref<16x32xf32, #tpu.memory_space<vmem>>, vector<16x32xf32>,
    return
  }
  func.func @transform_0(%arg0: i32) -> (i32, i32) {
    %c0_i32 = arith.constant 0 : i32
    %c0_i32_0 = arith.constant 0 : i32
    return %arg0, %c0_i32 : i32, i32
  }
  func.func @transform_1(%arg0: i32) -> (i32, i32) {
    %c0_i32 = arith.constant 0 : i32
    %c0_i32_0 = arith.constant 0 : i32
    %c0_i32_1 = arith.constant 0 : i32
    return %c0_i32, %c0_i32_0 : i32, i32
  }
  func.func @transform_2(%arg0: i32) -> (i32, i32) {
    %c0_i32 = arith.constant 0 : i32
    %c0_i32_0 = arith.constant 0 : i32
    %c0_i32_1 = arith.constant 0 : i32
    return %c0_i32, %c0_i32_0 : i32, i32
  }
  func.func @transform_3(%arg0: i32) -> (i32, i32) {
    %c0_i32 = arith.constant 0 : i32
    %c0_i32_0 = arith.constant 0 : i32
    return %arg0, %c0_i32 : i32, i32
  }
}

</mosaic_0001>

<bundles_post_ra>
// kernel: tpu_custom_call.1
= control target key start
LH: loop header
LB: loop body
LE: loop exit
PB: predicated region body
PF: predicated region fallthrough
CT: control target
= control target key end

     0   :  { %v176_v1 = vmov 0.0   ;;  %vm177_vm0 = vmmov 0   ;;  %s225_s0 = inlined_call_operand.vmem [shape: f32[16,64], index: 0, kind: input, shape index: {}]   ;;  %s226_s1 = inlined_call_operand.vmem [shape: bf16[64,32], index: 1, kind: input, shape index: {}]   ;;  %s227_s2 = inlined_call_operand.vmem [shape: f32[1,32], index: 2, kind: input, shape index: {}]   ;;  %s228_s3 = inlined_call_operand.hbm [shape: f32[16,32], index: 3, kind: output, shape index: {}]  }
   0x1   :  { %v150_v0 = vld [vmem:[%s226_s1 + $0x18] sm:$0xff]   ;;  %133 = vmatprep.subr.bf16.mxu0 %v176_v1  ;;  %v151_v2 = vld [vmem:[%s226_s1 + $0x10] sm:$0xff]   ;;  %141 = vmatprep.mubr.msk.bf16.mxu0 %vm177_vm0, %v176_v1 }
   0x2   :  { %134 = vmatpush3.bf16.msra.mxu0 %v150_v0 }
   0x3   :  { %135 = vmatprep.subr.bf16.mxu0 %v176_v1 }
   0x4   :  { %8 = vsyncpa [#allocation3], 0  ;;  %v152_v3 = vld [vmem:[%s226_s1 + $0x8] sm:$0xff]   ;;  %v153_v4 = vld [vmem:[%s226_s1] sm:$0xff]   ;;  %vm58_vm1 = vcmask 523264   ;;  %vm103_vm2 = vcmask 261120  }
   0x5   :  { %v16_v5 = vld [vmem:[%s225_s0] sm:$0xff]  ;;  %v17_v6 = vld [vmem:[%s225_s0 + $0x8] sm:$0xff]  ;;  %s178_s1 = smov [#allocation2]  }
   0x6   :  { %136 = vmatpush3.bf16.msra.mxu0 %v151_v2  ;;  %v18_v7 = vpack.c.bf16 %v17_v6, %v16_v5  ;;  %v122_v8 = vld [vmem:[%s227_s2] ss:$0 sm:$0xff]  ;;  %s111_s26 = sshll.u32 %s178_s1, 4  ;;  %s112_s26 = int_to_ptr.vmem [resolvable:$true] %s111_s26 }
   0x7   :  { %137 = vmatprep.subr.bf16.mxu0 %v176_v1  ;;  %s154_s0 = scalar_lea.vmem %s112_s26, 256  ;;  %p159_p1 = scmp.lt.s32.totalorder %s112_s26, %s112_s26 }
   0x8   :  { %p155_p0 = scmp.ne.s32.totalorder %s112_s26, %s154_s0  ;;  %p160_p2 = scmp.lt.s32.totalorder %s154_s0, %s154_s0 }
   0xa   :  { %138 = vmatpush3.bf16.msra.mxu0 %v152_v3  ;;  %p161_p3 = por %p160_p2, %p159_p1 }
   0xb   :  { %139 = vmatprep.subr.bf16.mxu0 %v176_v1 }
   0xc   :  { %p162_p4 = pnand %p161_p3, %p155_p0 }
   0xe   :  { %140 = vmatpush3.bf16.msra.mxu0 %v153_v4 }
  0x11   :  { %142 = vmatmul.mubr.msk.bf16.vlgmr.msra.gmra.mxu0 %vm58_vm1, %v18_v7 }
  0xd1   :  { %v96_v9 = vpop.f32.mrf.mxu0 }
  0xd2   :  { %v97_v10 = vadd.f32 %v122_v8, %v96_v9 }
  0xd3   :  { %v143_v11 = vpop.f32.mrf.mxu0 }
  0xd4   :  { %104 = vst.msk [vmem:[#allocation2] sm:$0xff] %vm103_vm2, %v97_v10 }
  0xd5   :  { %v99_v12 = vpop.f32.mrf.mxu0 }
  0xd6   :  { %v100_v13 = vadd.f32 %v122_v8, %v99_v12 }
  0xd7   :  { %v144_v14 = vpop.f32.mrf.mxu0 }
  0xd8   :  { %105 = vst.msk [vmem:[#allocation2 + $0x8] sm:$0xff] %vm103_vm2, %v100_v13 }
  0xd9   :  { %165 = shalt.err (!%p162_p4)
}
  0xda   :  { %s179_s2 = smov 128   ;;  %s180_s27 = smov 8  }
  0xdb   :  { %117 = dma.vmem_to_hbm [thread:$0]  %s112_s26, 256, %s228_s3, [#allocation3], %s179_s2, %s179_s2, %s180_s27  }
  0xdc   :  { %174 = dma.done.wait [#allocation3], 256  }
  0xdd   :  { %175 = vsyncadd [#allocation3], 4294967040 }
  0xde   :  { %121 = vsyncpa [#allocation3], 1 }

// kernel: tpu_custom_call.1
= control target key start
LH: loop header
LB: loop body
LE: loop exit
PB: predicated region body
PF: predicated region fallthrough
CT: control target
= control target key end

     0   :  { %v176_v1 = vmov 0.0   ;;  %vm177_vm0 = vmmov 0   ;;  %s225_s0 = inlined_call_operand.vmem [shape: f32[16,64], index: 0, kind: input, shape index: {}]   ;;  %s226_s1 = inlined_call_operand.vmem [shape: bf16[64,32], index: 1, kind: input, shape index: {}]   ;;  %s227_s2 = inlined_call_operand.vmem [shape: f32[1,32], index: 2, kind: input, shape index: {}]   ;;  %s228_s3 = inlined_call_operand.hbm [shape: f32[16,32], index: 3, kind: output, shape index: {}]  }
   0x1   :  { %v150_v0 = vld [vmem:[%s226_s1 + $0x18] sm:$0xff]   ;;  %133 = vmatprep.subr.bf16.mxu0 %v176_v1  ;;  %v151_v2 = vld [vmem:[%s226_s1 + $0x10] sm:$0xff]   ;;  %141 = vmatprep.mubr.msk.bf16.mxu0 %vm177_vm0, %v176_v1 }
   0x2   :  { %134 = vmatpush3.bf16.msra.mxu0 %v150_v0 }
   0x3   :  { %135 = vmatprep.subr.bf16.mxu0 %v176_v1 }
   0x4   :  { %8 = vsyncpa [#allocation3], 0  ;;  %v152_v3 = vld [vmem:[%s226_s1 + $0x8] sm:$0xff]   ;;  %v153_v4 = vld [vmem:[%s226_s1] sm:$0xff]   ;;  %vm58_vm1 = vcmask 523264   ;;  %vm103_vm2 = vcmask 261120  }
   0x5   :  { %v16_v5 = vld [vmem:[%s225_s0] sm:$0xff]  ;;  %v17_v6 = vld [vmem:[%s225_s0 + $0x8] sm:$0xff]  ;;  %s178_s1 = smov [#allocation2]  }
   0x6   :  { %136 = vmatpush3.bf16.msra.mxu0 %v151_v2  ;;  %v18_v7 = vpack.c.bf16 %v17_v6, %v16_v5  ;;  %v122_v8 = vld [vmem:[%s227_s2] ss:$0 sm:$0xff]  ;;  %s111_s26 = sshll.u32 %s178_s1, 4  ;;  %s112_s26 = int_to_ptr.vmem [resolvable:$true] %s111_s26 }
   0x7   :  { %137 = vmatprep.subr.bf16.mxu0 %v176_v1  ;;  %s154_s0 = scalar_lea.vmem %s112_s26, 256  ;;  %p159_p1 = scmp.lt.s32.totalorder %s112_s26, %s112_s26 }
   0x8   :  { %p155_p0 = scmp.ne.s32.totalorder %s112_s26, %s154_s0  ;;  %p160_p2 = scmp.lt.s32.totalorder %s154_s0, %s154_s0 }
   0xa   :  { %138 = vmatpush3.bf16.msra.mxu0 %v152_v3  ;;  %p161_p3 = por %p160_p2, %p159_p1 }
   0xb   :  { %139 = vmatprep.subr.bf16.mxu0 %v176_v1 }
   0xc   :  { %p162_p4 = pnand %p161_p3, %p155_p0 }
   0xe   :  { %140 = vmatpush3.bf16.msra.mxu0 %v153_v4 }
  0x11   :  { %142 = vmatmul.mubr.msk.bf16.vlgmr.msra.gmra.mxu0 %vm58_vm1, %v18_v7 }
  0xd1   :  { %v96_v9 = vpop.f32.mrf.mxu0 }
  0xd2   :  { %v97_v10 = vadd.f32 %v122_v8, %v96_v9 }
  0xd3   :  { %v143_v11 = vpop.f32.mrf.mxu0 }
  0xd4   :  { %104 = vst.msk [vmem:[#allocation2] sm:$0xff] %vm103_vm2, %v97_v10 }
  0xd5   :  { %v99_v12 = vpop.f32.mrf.mxu0 }
  0xd6   :  { %v100_v13 = vadd.f32 %v122_v8, %v99_v12 }
  0xd7   :  { %v144_v14 = vpop.f32.mrf.mxu0 }
  0xd8   :  { %105 = vst.msk [vmem:[#allocation2 + $0x8] sm:$0xff] %vm103_vm2, %v100_v13 }
  0xd9   :  { %165 = shalt.err (!%p162_p4)
}
  0xda   :  { %s179_s2 = smov 128   ;;  %s180_s27 = smov 8  }
  0xdb   :  { %117 = dma.vmem_to_hbm [thread:$0]  %s112_s26, 256, %s228_s3, [#allocation3], %s179_s2, %s179_s2, %s180_s27  }
  0xdc   :  { %174 = dma.done.wait [#allocation3], 256  }
  0xdd   :  { %175 = vsyncadd [#allocation3], 4294967040 }
  0xde   :  { %121 = vsyncpa [#allocation3], 1 }

</bundles_post_ra>
